<compile_context>
chip_gen: v5e
topology: v5e:2x2
jax: 0.10.0
libtpu: 0.0.40
codegen_flags: <defaults>
</compile_context>

<pallas_src>
import math
import functools

import jax
import jax.numpy as jnp
from jax.experimental import pallas as pl
from jax.experimental.pallas import tpu as pltpu


def _block_kernel(
    x_ref,
    ln1_g_ref, ln1_b_ref,
    wqkv_ref, bqkv_ref,
    wp_ref, bp_ref,
    ln2_g_ref, ln2_b_ref,
    w1_ref, b1_ref,
    w2_ref, b2_ref,
    out_ref,
    *,
    num_heads: int,
    seqs_per_tile: int,
    seq_len: int,
):
    eps = 1e-5
    x = x_ref[...]                              # (R, D) with R = seqs_per_tile * seq_len
    R, D = x.shape
    S, T = seqs_per_tile, seq_len
    hd = D // num_heads
    scale = 1.0 / math.sqrt(hd)
    inv_sqrt2 = 0.7071067811865476              # 1/sqrt(2), hoisted constant (mul, not div)

    # ---------------- LayerNorm 1 ----------------
    mu = jnp.mean(x, axis=-1, keepdims=True)
    var = jnp.mean((x - mu) ** 2, axis=-1, keepdims=True)
    h = (x - mu) * jax.lax.rsqrt(var + eps) * ln1_g_ref[0] + ln1_b_ref[0]

    # ---------------- Self-attention ----------------
    # Fused QKV projection: (R, D) @ (D, 3D) -> (R, 3D)
    qkv = jnp.dot(h, wqkv_ref[...], preferred_element_type=jnp.float32) + bqkv_ref[0]

    # The torch module's mask buffer is all ones -> plain (non-causal) softmax.
    # Heads: static loop (num_heads is small); each head uses a sequence-batched dot and
    # accumulates its projection contribution directly (no concatenate, bounded live range).
    y_proj = jnp.zeros((R, D), jnp.float32)
    for hidx in range(num_heads):
        q_sl = slice(hidx * hd, (hidx + 1) * hd)
        k_sl = slice(D + hidx * hd, D + (hidx + 1) * hd)
        v_sl = slice(2 * D + hidx * hd, 2 * D + (hidx + 1) * hd)

        qh = qkv[:, q_sl].reshape(S, T, hd) * scale   # fold 1/sqrt(hd) into q (R,hd) not (T,T)
        kh = qkv[:, k_sl].reshape(S, T, hd)
        vh = qkv[:, v_sl].reshape(S, T, hd)

        att = jnp.einsum("sqd,skd->sqk", qh, kh, preferred_element_type=jnp.float32)
        att = att - jnp.max(att, axis=-1, keepdims=True)
        p = jnp.exp(att)
        p = p * pl.reciprocal(jnp.sum(p, axis=-1, keepdims=True), approx=True)
        yh = jnp.einsum("sqk,skd->sqd", p, vh, preferred_element_type=jnp.float32)  # (S,T,hd)

        # y @ Wp == sum over heads of y_h @ Wp[h*hd:(h+1)*hd, :]
        y_proj = y_proj + jnp.dot(
            yh.reshape(R, hd), wp_ref[q_sl, :], preferred_element_type=jnp.float32
        )

    x1 = x + y_proj + bp_ref[0]                 # residual 1 (proj bias added once)

    # ---------------- LayerNorm 2 ----------------
    mu2 = jnp.mean(x1, axis=-1, keepdims=True)
    var2 = jnp.mean((x1 - mu2) ** 2, axis=-1, keepdims=True)
    h2 = (x1 - mu2) * jax.lax.rsqrt(var2 + eps) * ln2_g_ref[0] + ln2_b_ref[0]

    # ---------------- MLP: Linear(D,4D) -> exact GELU -> Linear(4D,D) ----------------
    m = jnp.dot(h2, w1_ref[...], preferred_element_type=jnp.float32) + b1_ref[0]   # (R, 4D)
    m = 0.5 * m * (1.0 + jax.lax.erf(m * inv_sqrt2))
    m = jnp.dot(m, w2_ref[...], preferred_element_type=jnp.float32) + b2_ref[0]    # (R, D)

    out_ref[...] = x1 + m                        # residual 2


def block_forward(x, params, *, num_heads, row_tile_target=256):
    """x: (B, T, D) float32. params: dict of weights, linear weights stored (in, out).

    row_tile_target: ~256 rows per grid step (use 128 on v5e).  Whole sequences are kept
    inside one tile so the attention softmax never crosses a grid boundary.
    """
    B, T, D = x.shape
    H = 4 * D
    assert D % num_heads == 0

    # Fold as many whole sequences as possible into one row tile (MXU M dimension).
    seqs_per_tile = 1
    for s in range(1, B + 1):
        if B % s == 0 and s * T <= row_tile_target:
            seqs_per_tile = s
    rows_tile = seqs_per_tile * T
    n_tiles = B // seqs_per_tile

    # Flatten rows; fuse Q/K/V weights (in real use pre-fuse once at parameter init).
    x2 = x.reshape(B * T, D)
    wqkv = jnp.concatenate([params["wq"], params["wk"], params["wv"]], axis=1)   # (D, 3D)
    bqkv = jnp.concatenate([params["bq"], params["bk"], params["bv"]], axis=1)   # (1, 3D)

    def const2d(shape):
        # grid-invariant full-array block (constant index_map -> no re-DMA across steps)
        return pl.BlockSpec(shape, lambda i: (0, 0))

    in_specs = [
        pl.BlockSpec((rows_tile, D), lambda i: (i, 0)),   # x row tile
        const2d((1, D)), const2d((1, D)),                 # ln1 gamma, beta
        const2d((D, 3 * D)), const2d((1, 3 * D)),         # fused Wqkv, bqkv
        const2d((D, D)), const2d((1, D)),                 # Wproj, bproj
        const2d((1, D)), const2d((1, D)),                 # ln2 gamma, beta
        const2d((D, H)), const2d((1, H)),                 # W1, b1
        const2d((H, D)), const2d((1, D)),                 # W2, b2
    ]

    kernel = functools.partial(
        _block_kernel, num_heads=num_heads, seqs_per_tile=seqs_per_tile, seq_len=T
    )

    flops = int(24 * B * T * D * D + 4 * B * T * T * D)
    transcendentals = int(B * T * T * num_heads + 4 * B * T * D + 2 * B * T)
    bytes_accessed = int(4 * (2 * B * T * D + 12 * D * D + 12 * D))

    out2 = pl.pallas_call(
        kernel,
        out_shape=jax.ShapeDtypeStruct((B * T, D), jnp.float32),
        grid_spec=pltpu.PrefetchScalarGridSpec(
            num_scalar_prefetch=0,
            grid=(n_tiles,),
            in_specs=in_specs,
            out_specs=pl.BlockSpec((rows_tile, D), lambda i: (i, 0)),
        ),
        compiler_params=pltpu.CompilerParams(
            dimension_semantics=("parallel",),
            vmem_limit_bytes=32 * 1024 * 1024,
        ),
        cost_estimate=pl.CostEstimate(
            flops=flops,
            transcendentals=transcendentals,
            bytes_accessed=bytes_accessed,
        ),
    )(
        x2,
        params["ln1_g"], params["ln1_b"],
        wqkv, bqkv,
        params["wp"], params["bp"],
        params["ln2_g"], params["ln2_b"],
        params["w1"], params["b1"],
        params["w2"], params["b2"],
    )
    return out2.reshape(B, T, D)


def block_forward_ref(x, params, *, num_heads):
    """Pure-JAX reference mirroring the PyTorch module (eval mode, mask==ones)."""
    B, T, D = x.shape
    hd = D // num_heads
    eps = 1e-5

    def ln(z, g, b):
        mu = jnp.mean(z, axis=-1, keepdims=True)
        var = jnp.mean((z - mu) ** 2, axis=-1, keepdims=True)
        return (z - mu) / jnp.sqrt(var + eps) * g[0] + b[0]

    h = ln(x, params["ln1_g"], params["ln1_b"])
    q = h @ params["wq"] + params["bq"][0]
    k = h @ params["wk"] + params["bk"][0]
    v = h @ params["wv"] + params["bv"][0]
    q = q.reshape(B, T, num_heads, hd).transpose(0, 2, 1, 3)
    k = k.reshape(B, T, num_heads, hd).transpose(0, 2, 1, 3)
    v = v.reshape(B, T, num_heads, hd).transpose(0, 2, 1, 3)
    att = jnp.einsum("bhqd,bhkd->bhqk", q, k) / math.sqrt(hd)
    att = jax.nn.softmax(att, axis=-1)
    y = jnp.einsum("bhqk,bhkd->bhqd", att, v)
    y = y.transpose(0, 2, 1, 3).reshape(B, T, D)
    y = y @ params["wp"] + params["bp"][0]
    x1 = x + y
    h2 = ln(x1, params["ln2_g"], params["ln2_b"])
    m = h2 @ params["w1"] + params["b1"][0]
    m = 0.5 * m * (1.0 + jax.lax.erf(m / jnp.sqrt(2.0)))
    m = m @ params["w2"] + params["b2"][0]
    return x1 + m


def make_params(key, D):
    H = 4 * D
    ks = jax.random.split(key, 8)
    s = 0.02

    def lin(k, din, dout):
        # stored as (in, out): kernel computes x @ W + b  (== PyTorch x @ W_t.T + b)
        return s * jax.random.normal(k, (din, dout), jnp.float32)

    return {
        "ln1_g": jnp.ones((1, D), jnp.float32),
        "ln1_b": jnp.zeros((1, D), jnp.float32),
        "wq": lin(ks[0], D, D), "bq": jnp.zeros((1, D), jnp.float32),
        "wk": lin(ks[1], D, D), "bk": jnp.zeros((1, D), jnp.float32),
        "wv": lin(ks[2], D, D), "bv": jnp.zeros((1, D), jnp.float32),
        "wp": lin(ks[3], D, D), "bp": jnp.zeros((1, D), jnp.float32),
        "ln2_g": jnp.ones((1, D), jnp.float32),
        "ln2_b": jnp.zeros((1, D), jnp.float32),
        "w1": lin(ks[4], D, H), "b1": s * jax.random.normal(ks[5], (1, H), jnp.float32),
        "w2": lin(ks[6], H, D), "b2": s * jax.random.normal(ks[7], (1, D), jnp.float32),
    }


if __name__ == "__main__":
    # Small shapes consistent with the module: B=2, T=num_blocks=8, D=32, heads=4.
    B, T, D, NH = 2, 8, 32, 4

    key = jax.random.PRNGKey(0)
    kx, kp = jax.random.split(key)
    x = jax.random.normal(kx, (B, T, D), jnp.float32)
    params = make_params(kp, D)

    out = block_forward(x, params, num_heads=NH)
    out = jax.block_until_ready(out)

    ref = block_forward_ref(x, params, num_heads=NH)
    assert out.shape == (B, T, D)
    # slightly loosened vs f32-exact because the softmax denominator uses the EUP
    # approximate reciprocal (pl.reciprocal(approx=True)).
    assert jnp.allclose(out, ref, rtol=1e-3, atol=1e-3), "mismatch vs JAX reference"

    print("KERNEL_OK")
</pallas_src>

<mosaic_0001>
module attributes {stable_mosaic.version = 11 : i64} {
  func.func @_block_kernel(%arg0: i32, %arg1: memref<16x32xf32, #tpu.memory_space<vmem>>, %arg2: memref<1x32xf32, #tpu.memory_space<vmem>>, %arg3: memref<1x32xf32, #tpu.memory_space<vmem>>, %arg4: memref<32x96xf32, #tpu.memory_space<vmem>>, %arg5: memref<1x96xf32, #tpu.memory_space<vmem>>, %arg6: memref<32x32xf32, #tpu.memory_space<vmem>>, %arg7: memref<1x32xf32, #tpu.memory_space<vmem>>, %arg8: memref<1x32xf32, #tpu.memory_space<vmem>>, %arg9: memref<1x32xf32, #tpu.memory_space<vmem>>, %arg10: memref<32x128xf32, #tpu.memory_space<vmem>>, %arg11: memref<1x128xf32, #tpu.memory_space<vmem>>, %arg12: memref<128x32xf32, #tpu.memory_space<vmem>>, %arg13: memref<1x32xf32, #tpu.memory_space<vmem>>, %arg14: memref<16x32xf32, #tpu.memory_space<vmem>>) attributes {dimension_semantics = [#tpu.dimension_semantics<parallel>], iteration_bounds = array<i64: 1>, scalar_prefetch = 0 : i64, scratch_operands = 0 : i64, tpu.core_type = #tpu.core_type<tc>, window_params = [{transform_indices = @transform_0, window_bounds = array<i64: 16, 32>}, {pipeline_mode = #tpu.pipeline_mode<synchronous>, transform_indices = @transform_1, window_bounds = array<i64: 1, 32>}, {pipeline_mode = #tpu.pipeline_mode<synchronous>, transform_indices = @transform_2, window_bounds = array<i64: 1, 32>}, {pipeline_mode = #tpu.pipeline_mode<synchronous>, transform_indices = @transform_3, window_bounds = array<i64: 32, 96>}, {pipeline_mode = #tpu.pipeline_mode<synchronous>, transform_indices = @transform_4, window_bounds = array<i64: 1, 96>}, {pipeline_mode = #tpu.pipeline_mode<synchronous>, transform_indices = @transform_5, window_bounds = array<i64: 32, 32>}, {pipeline_mode = #tpu.pipeline_mode<synchronous>, transform_indices = @transform_6, window_bounds = array<i64: 1, 32>}, {pipeline_mode = #tpu.pipeline_mode<synchronous>, transform_indices = @transform_7, window_bounds = array<i64: 1, 32>}, {pipeline_mode = #tpu.pipeline_mode<synchronous>, transform_indices = @transform_8, window_bounds = array<i64: 1, 32>}, {pipeline_mode = #tpu.pipeline_mode<synchronous>, transform_indices = @transform_9, window_bounds = array<i64: 32, 128>}, {pipeline_mode = #tpu.pipeline_mode<synchronous>, transform_indices = @transform_10, window_bounds = array<i64: 1, 128>}, {pipeline_mode = #tpu.pipeline_mode<synchronous>, transform_indices = @transform_11, window_bounds = array<i64: 128, 32>}, {pipeline_mode = #tpu.pipeline_mode<synchronous>, transform_indices = @transform_12, window_bounds = array<i64: 1, 32>}, {transform_indices = @transform_13, window_bounds = array<i64: 16, 32>}]} {
    %c0 = arith.constant 0 : index
    %c0_0 = arith.constant 0 : index
    %0 = vector.load %arg1[%c0, %c0_0] : memref<16x32xf32, #tpu.memory_space<vmem>>, vector<16x32xf32>
    %cst = arith.constant dense<0.000000e+00> : vector<16xf32>
    %1 = vector.multi_reduction <add>, %0, %cst [1] : vector<16x32xf32> to vector<16xf32>
    %2 = vector.shape_cast %1 : vector<16xf32> to vector<16x1xf32>
    %cst_1 = arith.constant 3.200000e+01 : f32
    %3 = vector.broadcast %cst_1 : f32 to vector<16x1xf32>
    %4 = arith.divf %2, %3 : vector<16x1xf32>
    %5 = vector.broadcast %4 : vector<16x1xf32> to vector<16x32xf32>
    %6 = arith.subf %0, %5 : vector<16x32xf32>
    %7 = arith.mulf %6, %6 : vector<16x32xf32>
    %cst_2 = arith.constant dense<0.000000e+00> : vector<16xf32>
    %8 = vector.multi_reduction <add>, %7, %cst_2 [1] : vector<16x32xf32> to vector<16xf32>
    %9 = vector.shape_cast %8 : vector<16xf32> to vector<16x1xf32>
    %cst_3 = arith.constant 3.200000e+01 : f32
    %10 = vector.broadcast %cst_3 : f32 to vector<16x1xf32>
    %11 = arith.divf %9, %10 : vector<16x1xf32>
    %12 = vector.broadcast %4 : vector<16x1xf32> to vector<16x32xf32>
    %13 = arith.subf %0, %12 : vector<16x32xf32>
    %cst_4 = arith.constant 9.99999974E-6 : f32
    %14 = vector.broadcast %cst_4 : f32 to vector<16x1xf32>
    %15 = arith.addf %11, %14 : vector<16x1xf32>
    %16 = math.rsqrt %15 : vector<16x1xf32>
    %17 = vector.broadcast %16 : vector<16x1xf32> to vector<16x32xf32>
    %18 = arith.mulf %13, %17 : vector<16x32xf32>
    %c0_5 = arith.constant 0 : index
    %c0_6 = arith.constant 0 : index
    %19 = vector.load %arg2[%c0_5, %c0_6] : memref<1x32xf32, #tpu.memory_space<vmem>>, vector<1x32xf32>
    %20 = vector.shape_cast %19 : vector<1x32xf32> to vector<32xf32>
    %21 = vector.shape_cast %20 : vector<32xf32> to vector<1x32xf32>
    %22 = vector.broadcast %21 : vector<1x32xf32> to vector<16x32xf32>
    %23 = arith.mulf %18, %22 : vector<16x32xf32>
    %c0_7 = arith.constant 0 : index
    %c0_8 = arith.constant 0 : index
    %24 = vector.load %arg3[%c0_7, %c0_8] : memref<1x32xf32, #tpu.memory_space<vmem>>, vector<1x32xf32>
    %25 = vector.shape_cast %24 : vector<1x32xf32> to vector<32xf32>
    %26 = vector.shape_cast %25 : vector<32xf32> to vector<1x32xf32>
    %27 = vector.broadcast %26 : vector<1x32xf32> to vector<16x32xf32>
    %28 = arith.addf %23, %27 : vector<16x32xf32>
    %c0_9 = arith.constant 0 : index
    %c0_10 = arith.constant 0 : index
    %29 = vector.load %arg4[%c0_9, %c0_10] : memref<32x96xf32, #tpu.memory_space<vmem>>, vector<32x96xf32>
    %cst_11 = arith.constant dense<0.000000e+00> : vector<16x96xf32>
    %30 = tpu.matmul %28, %29, %cst_11 {dimension_numbers = #tpu.dot_dimension_numbers<[1], [0], [0], [1], [0, 0, 1, 1], [], []>} : vector<16x32xf32>, vector<32x96xf32>, vector<16x96xf32> -> vector<16x96xf32>
    %c0_12 = arith.constant 0 : index
    %c0_13 = arith.constant 0 : index
    %31 = vector.load %arg5[%c0_12, %c0_13] : memref<1x96xf32, #tpu.memory_space<vmem>>, vector<1x96xf32>
    %32 = vector.shape_cast %31 : vector<1x96xf32> to vector<96xf32>
    %33 = vector.shape_cast %32 : vector<96xf32> to vector<1x96xf32>
    %34 = vector.broadcast %33 : vector<1x96xf32> to vector<16x96xf32>
    %35 = arith.addf %30, %34 : vector<16x96xf32>
    %cst_14 = arith.constant 0.000000e+00 : f32
    %36 = vector.broadcast %cst_14 : f32 to vector<16x32xf32>
    %37 = vector.extract_strided_slice %35 {offsets = [0, 0], sizes = [16, 8], strides = [1, 1]} : vector<16x96xf32> to vector<16x8xf32>
    %38 = vector.shape_cast %37 : vector<16x8xf32> to vector<2x8x8xf32>
    %cst_15 = arith.constant 0.353553385 : f32
    %39 = vector.broadcast %cst_15 : f32 to vector<2x8x8xf32>
    %40 = arith.mulf %38, %39 : vector<2x8x8xf32>
    %41 = vector.extract_strided_slice %35 {offsets = [0, 32], sizes = [16, 8], strides = [1, 1]} : vector<16x96xf32> to vector<16x8xf32>
    %42 = vector.shape_cast %41 : vector<16x8xf32> to vector<2x8x8xf32>
    %43 = vector.extract_strided_slice %35 {offsets = [0, 64], sizes = [16, 8], strides = [1, 1]} : vector<16x96xf32> to vector<16x8xf32>
    %44 = vector.shape_cast %43 : vector<16x8xf32> to vector<2x8x8xf32>
    "tpu.trace_start"() <{level = 10 : i32, message = "sqd,skd->sqk"}> : () -> ()
    %cst_16 = arith.constant dense<0.000000e+00> : vector<2x8x8xf32>
    %45 = tpu.matmul %40, %42, %cst_16 {dimension_numbers = #tpu.dot_dimension_numbers<[2], [2], [1], [1], [0, 0, 0, 1, 1, 1], [0], [0]>} : vector<2x8x8xf32>, vector<2x8x8xf32>, vector<2x8x8xf32> -> vector<2x8x8xf32>
    "tpu.trace_stop"() : () -> ()
    %cst_17 = arith.constant dense<0xFF800000> : vector<2x8xf32>
    %46 = vector.multi_reduction <maximumf>, %45, %cst_17 [2] : vector<2x8x8xf32> to vector<2x8xf32>
    %47 = vector.shape_cast %46 : vector<2x8xf32> to vector<2x8x1xf32>
    %48 = vector.broadcast %47 : vector<2x8x1xf32> to vector<2x8x8xf32>
    %49 = arith.subf %45, %48 : vector<2x8x8xf32>
    %50 = math.exp %49 : vector<2x8x8xf32>
    %cst_18 = arith.constant dense<0.000000e+00> : vector<2x8xf32>
    %51 = vector.multi_reduction <add>, %50, %cst_18 [2] : vector<2x8x8xf32> to vector<2x8xf32>
    %52 = vector.shape_cast %51 : vector<2x8xf32> to vector<2x8x1xf32>
    %53 = tpu.reciprocal %52 {approx = true} : vector<2x8x1xf32> -> vector<2x8x1xf32>
    %54 = vector.broadcast %53 : vector<2x8x1xf32> to vector<2x8x8xf32>
    %55 = arith.mulf %50, %54 : vector<2x8x8xf32>
    "tpu.trace_start"() <{level = 10 : i32, message = "sqk,skd->sqd"}> : () -> ()
    %cst_19 = arith.constant dense<0.000000e+00> : vector<2x8x8xf32>
    %56 = tpu.matmul %55, %44, %cst_19 {dimension_numbers = #tpu.dot_dimension_numbers<[2], [1], [1], [2], [0, 0, 0, 1, 1, 2], [0], [0]>} : vector<2x8x8xf32>, vector<2x8x8xf32>, vector<2x8x8xf32> -> vector<2x8x8xf32>
    "tpu.trace_stop"() : () -> ()
    %57 = vector.shape_cast %56 : vector<2x8x8xf32> to vector<16x8xf32>
    %c0_20 = arith.constant 0 : index
    %c0_21 = arith.constant 0 : index
    %58 = vector.load %arg6[%c0_20, %c0_21] : memref<32x32xf32, #tpu.memory_space<vmem>>, vector<8x32xf32>
    %cst_22 = arith.constant dense<0.000000e+00> : vector<16x32xf32>
    %59 = tpu.matmul %57, %58, %cst_22 {dimension_numbers = #tpu.dot_dimension_numbers<[1], [0], [0], [1], [0, 0, 1, 1], [], []>} : vector<16x8xf32>, vector<8x32xf32>, vector<16x32xf32> -> vector<16x32xf32>
    %60 = arith.addf %36, %59 : vector<16x32xf32>
    %61 = vector.extract_strided_slice %35 {offsets = [0, 8], sizes = [16, 8], strides = [1, 1]} : vector<16x96xf32> to vector<16x8xf32>
    %62 = vector.shape_cast %61 : vector<16x8xf32> to vector<2x8x8xf32>
    %cst_23 = arith.constant 0.353553385 : f32
    %63 = vector.broadcast %cst_23 : f32 to vector<2x8x8xf32>
    %64 = arith.mulf %62, %63 : vector<2x8x8xf32>
    %65 = vector.extract_strided_slice %35 {offsets = [0, 40], sizes = [16, 8], strides = [1, 1]} : vector<16x96xf32> to vector<16x8xf32>
    %66 = vector.shape_cast %65 : vector<16x8xf32> to vector<2x8x8xf32>
    %67 = vector.extract_strided_slice %35 {offsets = [0, 72], sizes = [16, 8], strides = [1, 1]} : vector<16x96xf32> to vector<16x8xf32>
    %68 = vector.shape_cast %67 : vector<16x8xf32> to vector<2x8x8xf32>
    "tpu.trace_start"() <{level = 10 : i32, message = "sqd,skd->sqk"}> : () -> ()
    %cst_24 = arith.constant dense<0.000000e+00> : vector<2x8x8xf32>
    %69 = tpu.matmul %64, %66, %cst_24 {dimension_numbers = #tpu.dot_dimension_numbers<[2], [2], [1], [1], [0, 0, 0, 1, 1, 1], [0], [0]>} : vector<2x8x8xf32>, vector<2x8x8xf32>, vector<2x8x8xf32> -> vector<2x8x8xf32>
    "tpu.trace_stop"() : () -> ()
    %cst_25 = arith.constant dense<0xFF800000> : vector<2x8xf32>
    %70 = vector.multi_reduction <maximumf>, %69, %cst_25 [2] : vector<2x8x8xf32> to vector<2x8xf32>
    %71 = vector.shape_cast %70 : vector<2x8xf32> to vector<2x8x1xf32>
    %72 = vector.broadcast %71 : vector<2x8x1xf32> to vector<2x8x8xf32>
    %73 = arith.subf %69, %72 : vector<2x8x8xf32>
    %74 = math.exp %73 : vector<2x8x8xf32>
    %cst_26 = arith.constant dense<0.000000e+00> : vector<2x8xf32>
    %75 = vector.multi_reduction <add>, %74, %cst_26 [2] : vector<2x8x8xf32> to vector<2x8xf32>
    %76 = vector.shape_cast %75 : vector<2x8xf32> to vector<2x8x1xf32>
    %77 = tpu.reciprocal %76 {approx = true} : vector<2x8x1xf32> -> vector<2x8x1xf32>
    %78 = vector.broadcast %77 : vector<2x8x1xf32> to vector<2x8x8xf32>
    %79 = arith.mulf %74, %78 : vector<2x8x8xf32>
    "tpu.trace_start"() <{level = 10 : i32, message = "sqk,skd->sqd"}> : () -> ()
    %cst_27 = arith.constant dense<0.000000e+00> : vector<2x8x8xf32>
    %80 = tpu.matmul %79, %68, %cst_27 {dimension_numbers = #tpu.dot_dimension_numbers<[2], [1], [1], [2], [0, 0, 0, 1, 1, 2], [0], [0]>} : vector<2x8x8xf32>, vector<2x8x8xf32>, vector<2x8x8xf32> -> vector<2x8x8xf32>
    "tpu.trace_stop"() : () -> ()
    %81 = vector.shape_cast %80 : vector<2x8x8xf32> to vector<16x8xf32>
    %c8 = arith.constant 8 : index
    %c0_28 = arith.constant 0 : index
    %82 = vector.load %arg6[%c8, %c0_28] : memref<32x32xf32, #tpu.memory_space<vmem>>, vector<8x32xf32>
    %cst_29 = arith.constant dense<0.000000e+00> : vector<16x32xf32>
    %83 = tpu.matmul %81, %82, %cst_29 {dimension_numbers = #tpu.dot_dimension_numbers<[1], [0], [0], [1], [0, 0, 1, 1], [], []>} : vector<16x8xf32>, vector<8x32xf32>, vector<16x32xf32> -> vector<16x32xf32>
    %84 = arith.addf %60, %83 : vector<16x32xf32>
    %85 = vector.extract_strided_slice %35 {offsets = [0, 16], sizes = [16, 8], strides = [1, 1]} : vector<16x96xf32> to vector<16x8xf32>
    %86 = vector.shape_cast %85 : vector<16x8xf32> to vector<2x8x8xf32>
    %cst_30 = arith.constant 0.353553385 : f32
    %87 = vector.broadcast %cst_30 : f32 to vector<2x8x8xf32>
    %88 = arith.mulf %86, %87 : vector<2x8x8xf32>
    %89 = vector.extract_strided_slice %35 {offsets = [0, 48], sizes = [16, 8], strides = [1, 1]} : vector<16x96xf32> to vector<16x8xf32>
    %90 = vector.shape_cast %89 : vector<16x8xf32> to vector<2x8x8xf32>
    %91 = vector.extract_strided_slice %35 {offsets = [0, 80], sizes = [16, 8], strides = [1, 1]} : vector<16x96xf32> to vector<16x8xf32>
    %92 = vector.shape_cast %91 : vector<16x8xf32> to vector<2x8x8xf32>
    "tpu.trace_start"() <{level = 10 : i32, message = "sqd,skd->sqk"}> : () -> ()
    %cst_31 = arith.constant dense<0.000000e+00> : vector<2x8x8xf32>
    %93 = tpu.matmul %88, %90, %cst_31 {dimension_numbers = #tpu.dot_dimension_numbers<[2], [2], [1], [1], [0, 0, 0, 1, 1, 1], [0], [0]>} : vector<2x8x8xf32>, vector<2x8x8xf32>, vector<2x8x8xf32> -> vector<2x8x8xf32>
    "tpu.trace_stop"() : () -> ()
    %cst_32 = arith.constant dense<0xFF800000> : vector<2x8xf32>
    %94 = vector.multi_reduction <maximumf>, %93, %cst_32 [2] : vector<2x8x8xf32> to vector<2x8xf32>
    %95 = vector.shape_cast %94 : vector<2x8xf32> to vector<2x8x1xf32>
    %96 = vector.broadcast %95 : vector<2x8x1xf32> to vector<2x8x8xf32>
    %97 = arith.subf %93, %96 : vector<2x8x8xf32>
    %98 = math.exp %97 : vector<2x8x8xf32>
    %cst_33 = arith.constant dense<0.000000e+00> : vector<2x8xf32>
    %99 = vector.multi_reduction <add>, %98, %cst_33 [2] : vector<2x8x8xf32> to vector<2x8xf32>
    %100 = vector.shape_cast %99 : vector<2x8xf32> to vector<2x8x1xf32>
    %101 = tpu.reciprocal %100 {approx = true} : vector<2x8x1xf32> -> vector<2x8x1xf32>
    %102 = vector.broadcast %101 : vector<2x8x1xf32> to vector<2x8x8xf32>
    %103 = arith.mulf %98, %102 : vector<2x8x8xf32>
    "tpu.trace_start"() <{level = 10 : i32, message = "sqk,skd->sqd"}> : () -> ()
    %cst_34 = arith.constant dense<0.000000e+00> : vector<2x8x8xf32>
    %104 = tpu.matmul %103, %92, %cst_34 {dimension_numbers = #tpu.dot_dimension_numbers<[2], [1], [1], [2], [0, 0, 0, 1, 1, 2], [0], [0]>} : vector<2x8x8xf32>, vector<2x8x8xf32>, vector<2x8x8xf32> -> vector<2x8x8xf32>
    "tpu.trace_stop"() : () -> ()
    %105 = vector.shape_cast %104 : vector<2x8x8xf32> to vector<16x8xf32>
    %c16 = arith.constant 16 : index
    %c0_35 = arith.constant 0 : index
    %106 = vector.load %arg6[%c16, %c0_35] : memref<32x32xf32, #tpu.memory_space<vmem>>, vector<8x32xf32>
    %cst_36 = arith.constant dense<0.000000e+00> : vector<16x32xf32>
    %107 = tpu.matmul %105, %106, %cst_36 {dimension_numbers = #tpu.dot_dimension_numbers<[1], [0], [0], [1], [0, 0, 1, 1], [], []>} : vector<16x8xf32>, vector<8x32xf32>, vector<16x32xf32> -> vector<16x32xf32>
    %108 = arith.addf %84, %107 : vector<16x32xf32>
    %109 = vector.extract_strided_slice %35 {offsets = [0, 24], sizes = [16, 8], strides = [1, 1]} : vector<16x96xf32> to vector<16x8xf32>
    %110 = vector.shape_cast %109 : vector<16x8xf32> to vector<2x8x8xf32>
    %cst_37 = arith.constant 0.353553385 : f32
    %111 = vector.broadcast %cst_37 : f32 to vector<2x8x8xf32>
    %112 = arith.mulf %110, %111 : vector<2x8x8xf32>
    %113 = vector.extract_strided_slice %35 {offsets = [0, 56], sizes = [16, 8], strides = [1, 1]} : vector<16x96xf32> to vector<16x8xf32>
    %114 = vector.shape_cast %113 : vector<16x8xf32> to vector<2x8x8xf32>
    %115 = vector.extract_strided_slice %35 {offsets = [0, 88], sizes = [16, 8], strides = [1, 1]} : vector<16x96xf32> to vector<16x8xf32>
    %116 = vector.shape_cast %115 : vector<16x8xf32> to vector<2x8x8xf32>
    "tpu.trace_start"() <{level = 10 : i32, message = "sqd,skd->sqk"}> : () -> ()
    %cst_38 = arith.constant dense<0.000000e+00> : vector<2x8x8xf32>
    %117 = tpu.matmul %112, %114, %cst_38 {dimension_numbers = #tpu.dot_dimension_numbers<[2], [2], [1], [1], [0, 0, 0, 1, 1, 1], [0], [0]>} : vector<2x8x8xf32>, vector<2x8x8xf32>, vector<2x8x8xf32> -> vector<2x8x8xf32>
    "tpu.trace_stop"() : () -> ()
    %cst_39 = arith.constant dense<0xFF800000> : vector<2x8xf32>
    %118 = vector.multi_reduction <maximumf>, %117, %cst_39 [2] : vector<2x8x8xf32> to vector<2x8xf32>
    %119 = vector.shape_cast %118 : vector<2x8xf32> to vector<2x8x1xf32>
    %120 = vector.broadcast %119 : vector<2x8x1xf32> to vector<2x8x8xf32>
    %121 = arith.subf %117, %120 : vector<2x8x8xf32>
    %122 = math.exp %121 : vector<2x8x8xf32>
    %cst_40 = arith.constant dense<0.000000e+00> : vector<2x8xf32>
    %123 = vector.multi_reduction <add>, %122, %cst_40 [2] : vector<2x8x8xf32> to vector<2x8xf32>
    %124 = vector.shape_cast %123 : vector<2x8xf32> to vector<2x8x1xf32>
    %125 = tpu.reciprocal %124 {approx = true} : vector<2x8x1xf32> -> vector<2x8x1xf32>
    %126 = vector.broadcast %125 : vector<2x8x1xf32> to vector<2x8x8xf32>
    %127 = arith.mulf %122, %126 : vector<2x8x8xf32>
    "tpu.trace_start"() <{level = 10 : i32, message = "sqk,skd->sqd"}> : () -> ()
    %cst_41 = arith.constant dense<0.000000e+00> : vector<2x8x8xf32>
    %128 = tpu.matmul %127, %116, %cst_41 {dimension_numbers = #tpu.dot_dimension_numbers<[2], [1], [1], [2], [0, 0, 0, 1, 1, 2], [0], [0]>} : vector<2x8x8xf32>, vector<2x8x8xf32>, vector<2x8x8xf32> -> vector<2x8x8xf32>
    "tpu.trace_stop"() : () -> ()
    %129 = vector.shape_cast %128 : vector<2x8x8xf32> to vector<16x8xf32>
    %c24 = arith.constant 24 : index
    %c0_42 = arith.constant 0 : index
    %130 = vector.load %arg6[%c24, %c0_42] : memref<32x32xf32, #tpu.memory_space<vmem>>, vector<8x32xf32>
    %cst_43 = arith.constant dense<0.000000e+00> : vector<16x32xf32>
    %131 = tpu.matmul %129, %130, %cst_43 {dimension_numbers = #tpu.dot_dimension_numbers<[1], [0], [0], [1], [0, 0, 1, 1], [], []>} : vector<16x8xf32>, vector<8x32xf32>, vector<16x32xf32> -> vector<16x32xf32>
    %132 = arith.addf %108, %131 : vector<16x32xf32>
    %133 = arith.addf %0, %132 : vector<16x32xf32>
    %c0_44 = arith.constant 0 : index
    %c0_45 = arith.constant 0 : index
    %134 = vector.load %arg7[%c0_44, %c0_45] : memref<1x32xf32, #tpu.memory_space<vmem>>, vector<1x32xf32>
    %135 = vector.shape_cast %134 : vector<1x32xf32> to vector<32xf32>
    %136 = vector.shape_cast %135 : vector<32xf32> to vector<1x32xf32>
    %137 = vector.broadcast %136 : vector<1x32xf32> to vector<16x32xf32>
    %138 = arith.addf %133, %137 : vector<16x32xf32>
    %cst_46 = arith.constant dense<0.000000e+00> : vector<16xf32>
    %139 = vector.multi_reduction <add>, %138, %cst_46 [1] : vector<16x32xf32> to vector<16xf32>
    %140 = vector.shape_cast %139 : vector<16xf32> to vector<16x1xf32>
    %cst_47 = arith.constant 3.200000e+01 : f32
    %141 = vector.broadcast %cst_47 : f32 to vector<16x1xf32>
    %142 = arith.divf %140, %141 : vector<16x1xf32>
    %143 = vector.broadcast %142 : vector<16x1xf32> to vector<16x32xf32>
    %144 = arith.subf %138, %143 : vector<16x32xf32>
    %145 = arith.mulf %144, %144 : vector<16x32xf32>
    %cst_48 = arith.constant dense<0.000000e+00> : vector<16xf32>
    %146 = vector.multi_reduction <add>, %145, %cst_48 [1] : vector<16x32xf32> to vector<16xf32>
    %147 = vector.shape_cast %146 : vector<16xf32> to vector<16x1xf32>
    %cst_49 = arith.constant 3.200000e+01 : f32
    %148 = vector.broadcast %cst_49 : f32 to vector<16x1xf32>
    %149 = arith.divf %147, %148 : vector<16x1xf32>
    %150 = vector.broadcast %142 : vector<16x1xf32> to vector<16x32xf32>
    %151 = arith.subf %138, %150 : vector<16x32xf32>
    %cst_50 = arith.constant 9.99999974E-6 : f32
    %152 = vector.broadcast %cst_50 : f32 to vector<16x1xf32>
    %153 = arith.addf %149, %152 : vector<16x1xf32>
    %154 = math.rsqrt %153 : vector<16x1xf32>
    %155 = vector.broadcast %154 : vector<16x1xf32> to vector<16x32xf32>
    %156 = arith.mulf %151, %155 : vector<16x32xf32>
    %c0_51 = arith.constant 0 : index
    %c0_52 = arith.constant 0 : index
    %157 = vector.load %arg8[%c0_51, %c0_52] : memref<1x32xf32, #tpu.memory_space<vmem>>, vector<1x32xf32>
    %158 = vector.shape_cast %157 : vector<1x32xf32> to vector<32xf32>
    %159 = vector.shape_cast %158 : vector<32xf32> to vector<1x32xf32>
    %160 = vector.broadcast %159 : vector<1x32xf32> to vector<16x32xf32>
    %161 = arith.mulf %156, %160 : vector<16x32xf32>
    %c0_53 = arith.constant 0 : index
    %c0_54 = arith.constant 0 : index
    %162 = vector.load %arg9[%c0_53, %c0_54] : memref<1x32xf32, #tpu.memory_space<vmem>>, vector<1x32xf32>
    %163 = vector.shape_cast %162 : vector<1x32xf32> to vector<32xf32>
    %164 = vector.shape_cast %163 : vector<32xf32> to vector<1x32xf32>
    %165 = vector.broadcast %164 : vector<1x32xf32> to vector<16x32xf32>
    %166 = arith.addf %161, %165 : vector<16x32xf32>
    %c0_55 = arith.constant 0 : index
    %c0_56 = arith.constant 0 : index
    %167 = vector.load %arg10[%c0_55, %c0_56] : memref<32x128xf32, #tpu.memory_space<vmem>>, vector<32x128xf32>
    %cst_57 = arith.constant dense<0.000000e+00> : vector<16x128xf32>
    %168 = tpu.matmul %166, %167, %cst_57 {dimension_numbers = #tpu.dot_dimension_numbers<[1], [0], [0], [1], [0, 0, 1, 1], [], []>} : vector<16x32xf32>, vector<32x128xf32>, vector<16x128xf32> -> vector<16x128xf32>
    %c0_58 = arith.constant 0 : index
    %c0_59 = arith.constant 0 : index
    %169 = vector.load %arg11[%c0_58, %c0_59] : memref<1x128xf32, #tpu.memory_space<vmem>>, vector<1x128xf32>
    %170 = vector.shape_cast %169 : vector<1x128xf32> to vector<128xf32>
    %171 = vector.shape_cast %170 : vector<128xf32> to vector<1x128xf32>
    %172 = vector.broadcast %171 : vector<1x128xf32> to vector<16x128xf32>
    %173 = arith.addf %168, %172 : vector<16x128xf32>
    %cst_60 = arith.constant 5.000000e-01 : f32
    %174 = vector.broadcast %cst_60 : f32 to vector<16x128xf32>
    %175 = arith.mulf %174, %173 : vector<16x128xf32>
    %cst_61 = arith.constant 0.707106769 : f32
    %176 = vector.broadcast %cst_61 : f32 to vector<16x128xf32>
    %177 = arith.mulf %173, %176 : vector<16x128xf32>
    %178 = math.erf %177 : vector<16x128xf32>
    %cst_62 = arith.constant 1.000000e+00 : f32
    %179 = vector.broadcast %cst_62 : f32 to vector<16x128xf32>
    %180 = arith.addf %179, %178 : vector<16x128xf32>
    %181 = arith.mulf %175, %180 : vector<16x128xf32>
    %c0_63 = arith.constant 0 : index
    %c0_64 = arith.constant 0 : index
    %182 = vector.load %arg12[%c0_63, %c0_64] : memref<128x32xf32, #tpu.memory_space<vmem>>, vector<128x32xf32>
    %cst_65 = arith.constant dense<0.000000e+00> : vector<16x32xf32>
    %183 = tpu.matmul %181, %182, %cst_65 {dimension_numbers = #tpu.dot_dimension_numbers<[1], [0], [0], [1], [0, 0, 1, 1], [], []>} : vector<16x128xf32>, vector<128x32xf32>, vector<16x32xf32> -> vector<16x32xf32>
    %c0_66 = arith.constant 0 : index
    %c0_67 = arith.constant 0 : index
    %184 = vector.load %arg13[%c0_66, %c0_67] : memref<1x32xf32, #tpu.memory_space<vmem>>, vector<1x32xf32>
    %185 = vector.shape_cast %184 : vector<1x32xf32> to vector<32xf32>
    %186 = vector.shape_cast %185 : vector<32xf32> to vector<1x32xf32>
    %187 = vector.broadcast %186 : vector<1x32xf32> to vector<16x32xf32>
    %188 = arith.addf %183, %187 : vector<16x32xf32>
    %189 = arith.addf %138, %188 : vector<16x32xf32>
    %c0_68 = arith.constant 0 : index
    %c0_69 = arith.constant 0 : index
    %190 = vector.load %arg14[%c0_68, %c0_69] : memref<16x32xf32, #tpu.memory_space<vmem>>, vector<16x32xf32>
    tpu.vector_store %arg14[%c0_68, %c0_69], %189 {strides = array<i32>} : memref<16x32xf32, #tpu.memory_space<vmem>>, vector<16x32xf32>,
    return
  }
  func.func @transform_0(%arg0: i32) -> (i32, i32) {
    %c0_i32 = arith.constant 0 : i32
    %c0_i32_0 = arith.constant 0 : i32
    return %arg0, %c0_i32 : i32, i32
  }
  func.func @transform_1(%arg0: i32) -> (i32, i32) {
    %c0_i32 = arith.constant 0 : i32
    %c0_i32_0 = arith.constant 0 : i32
    %c0_i32_1 = arith.constant 0 : i32
    return %c0_i32, %c0_i32_0 : i32, i32
  }
  func.func @transform_2(%arg0: i32) -> (i32, i32) {
    %c0_i32 = arith.constant 0 : i32
    %c0_i32_0 = arith.constant 0 : i32
    %c0_i32_1 = arith.constant 0 : i32
    return %c0_i32, %c0_i32_0 : i32, i32
  }
  func.func @transform_3(%arg0: i32) -> (i32, i32) {
    %c0_i32 = arith.constant 0 : i32
    %c0_i32_0 = arith.constant 0 : i32
    %c0_i32_1 = arith.constant 0 : i32
    return %c0_i32, %c0_i32_0 : i32, i32
  }
  func.func @transform_4(%arg0: i32) -> (i32, i32) {
    %c0_i32 = arith.constant 0 : i32
    %c0_i32_0 = arith.constant 0 : i32
    %c0_i32_1 = arith.constant 0 : i32
    return %c0_i32, %c0_i32_0 : i32, i32
  }
  func.func @transform_5(%arg0: i32) -> (i32, i32) {
    %c0_i32 = arith.constant 0 : i32
    %c0_i32_0 = arith.constant 0 : i32
    %c0_i32_1 = arith.constant 0 : i32
    return %c0_i32, %c0_i32_0 : i32, i32
  }
  func.func @transform_6(%arg0: i32) -> (i32, i32) {
    %c0_i32 = arith.constant 0 : i32
    %c0_i32_0 = arith.constant 0 : i32
    %c0_i32_1 = arith.constant 0 : i32
    return %c0_i32, %c0_i32_0 : i32, i32
  }
  func.func @transform_7(%arg0: i32) -> (i32, i32) {
    %c0_i32 = arith.constant 0 : i32
    %c0_i32_0 = arith.constant 0 : i32
    %c0_i32_1 = arith.constant 0 : i32
    return %c0_i32, %c0_i32_0 : i32, i32
  }
  func.func @transform_8(%arg0: i32) -> (i32, i32) {
    %c0_i32 = arith.constant 0 : i32
    %c0_i32_0 = arith.constant 0 : i32
    %c0_i32_1 = arith.constant 0 : i32
    return %c0_i32, %c0_i32_0 : i32, i32
  }
  func.func @transform_9(%arg0: i32) -> (i32, i32) {
    %c0_i32 = arith.constant 0 : i32
    %c0_i32_0 = arith.constant 0 : i32
    %c0_i32_1 = arith.constant 0 : i32
    return %c0_i32, %c0_i32_0 : i32, i32
  }
  func.func @transform_10(%arg0: i32) -> (i32, i32) {
    %c0_i32 = arith.constant 0 : i32
    %c0_i32_0 = arith.constant 0 : i32
    %c0_i32_1 = arith.constant 0 : i32
    return %c0_i32, %c0_i32_0 : i32, i32
  }
  func.func @transform_11(%arg0: i32) -> (i32, i32) {
    %c0_i32 = arith.constant 0 : i32
    %c0_i32_0 = arith.constant 0 : i32
    %c0_i32_1 = arith.constant 0 : i32
    return %c0_i32, %c0_i32_0 : i32, i32
  }
  func.func @transform_12(%arg0: i32) -> (i32, i32) {
    %c0_i32 = arith.constant 0 : i32
    %c0_i32_0 = arith.constant 0 : i32
    %c0_i32_1 = arith.constant 0 : i32
    return %c0_i32, %c0_i32_0 : i32, i32
  }
  func.func @transform_13(%arg0: i32) -> (i32, i32) {
    %c0_i32 = arith.constant 0 : i32
    %c0_i32_0 = arith.constant 0 : i32
    return %arg0, %c0_i32 : i32, i32
  }
}

</mosaic_0001>

<bundles_post_ra>
// kernel: tpu_custom_call.1
= control target key start
LH: loop header
LB: loop body
LE: loop exit
PB: predicated region body
PF: predicated region fallthrough
CT: control target
= control target key end

     0   :  { %vm47_vm0 = vcmask 261120   ;;  %s1536_s0 = inlined_call_operand.vmem [shape: f32[16,32], index: 0, kind: input, shape index: {}]   ;;  %s1537_s1 = inlined_call_operand.vmem [shape: f32[1,32], index: 1, kind: input, shape index: {}]   ;;  %s1538_s2 = inlined_call_operand.vmem [shape: f32[1,32], index: 2, kind: input, shape index: {}]   ;;  %s1539_s3 = inlined_call_operand.vmem [shape: f32[32,96], index: 3, kind: input, shape index: {}]   ;;  %s1540_s4 = inlined_call_operand.vmem [shape: f32[1,96], index: 4, kind: input, shape index: {}]   ;;  %s1541_s5 = inlined_call_operand.vmem [shape: f32[32,32], index: 5, kind: input, shape index: {}]   ;;  %s1542_s6 = inlined_call_operand.vmem [shape: f32[1,32], index: 6, kind: input, shape index: {}]   ;;  %s1543_s7 = inlined_call_operand.vmem [shape: f32[1,32], index: 7, kind: input, shape index: {}]   ;;  %s1544_s8 = inlined_call_operand.vmem [shape: f32[1,32], index: 8, kind: input, shape index: {}]   ;;  %s1545_s9 = inlined_call_operand.vmem [shape: f32[32,128], index: 9, kind: input, shape index: {}]   ;;  %s1546_s10 = inlined_call_operand.vmem [shape: f32[1,128], index: 10, kind: input, shape index: {}]   ;;  %s1547_s11 = inlined_call_operand.vmem [shape: f32[128,32], index: 11, kind: input, shape index: {}]   ;;  %s1548_s12 = inlined_call_operand.vmem [shape: f32[1,32], index: 12, kind: input, shape index: {}]   ;;  %s1549_s13 = inlined_call_operand.hbm [shape: f32[16,32], index: 13, kind: output, shape index: {}]  }
   0x1   :  { %v1270_v0 = vld [vmem:[%s1536_s0] sm:$0xff] }
   0x2   :  { %v48_v1 = vsel %vm47_vm0, %v1270_v0, 0.0 }
   0x3   :  { %49 = vadd.xlane.f32.xlu0 %v48_v1 }
   0x4   :  { %18 = vsyncpa [#allocation3], 0  ;;  %v1277_v2 = vld [vmem:[%s1536_s0 + $0x8] sm:$0xff]  ;;  %v1182_v4 = vmov 32.0   ;;  %v114_v21 = vld [vmem:[%s1539_s3 + $0x18] sm:$0xff]  ;;  %s1184_s23 = smov 96  }
   0x5   :  { %v51_v3 = vsel %vm47_vm0, %v1277_v2, 0.0  ;;  %1110 = vrcp.f32 %v1182_v4  ;;  %137 = vmatpush.msra.mxu0 %v114_v21  ;;  %v113_v22 = vld [vmem:[%s1539_s3 + $0x10] sm:$0xff]  ;;  %v112_v23 = vld [vmem:[%s1539_s3 + $0x8] sm:$0xff]  ;;  %v111_v24 = vld [vmem:[%s1539_s3] sm:$0xff]  ;;  %s1185_s24 = smov 120   ;;  %vm153_vm8 = vcmask 64512  }
   0x6   :  { %v1102_v39 = vld [vmem:[%s1537_s1] ss:$0 sm:$0xff]  ;;  %s1187_s25 = smov 80   ;;  %s1188_s26 = smov 112  }
   0x7   :  { %138 = vmatpush.msra.mxu0 %v113_v22  ;;  %v1103_v43 = vld [vmem:[%s1538_s2] ss:$0 sm:$0xff]  ;;  %s1183_s2 = smov 88   ;;  %s1189_s27 = smov 56  }
   0x8   :  { %v1104_v53 = vld [vmem:[%s1540_s4] ss:$0 sm:$0xff]  ;;  %s1186_s4 = smov 64   ;;  %s1190_s28 = smov 72  }
   0x9   :  { %139 = vmatpush.msra.mxu0 %v112_v23  ;;  %s1191_s15 = smov 48   ;;  %s1192_s16 = smov 104  }
   0xa   :  { %s1193_s3 = smov 40   ;;  %s1037_s19 = sshll.u32 %s1549_s13, 4  ;;  %s1038_s19 = int_to_ptr.hbm [resolvable:$true] %s1037_s19 }
   0xb   :  { %52 = vadd.xlane.f32.xlu0 %v51_v3  ;;  %v1111_v5 = vpop.eup %1110  ;;  %140 = vmatpush.msra.mxu0 %v111_v24  ;;  %s1196_s20 = smov 8  }
   0xc   :  { %v55_v6 = vmul.f32 32.0, %v1111_v5  ;;  %vm59_vm1 = vweird.f32 %v1111_v5 }
   0xe   :  { %v56_v7 = vsub.f32 1.0, %v55_v6 }
  0x10   :  { %v57_v8 = vmul.f32 %v1111_v5, %v56_v7 }
  0x12   :  { %v58_v9 = vadd.f32 %v1111_v5, %v57_v8 }
  0x14   :  { %v1281_v10 = vsel %vm59_vm1, %v1111_v5, %v58_v9 }
  0x76   :  { %v50_v11 = vpop.xlane.xlu0 %49 }
  0x77   :  { %v61_v12 = vmul.f32 %v1281_v10, %v50_v11 }
  0x79   :  { %v63_v13 = vsub.f32 %v1270_v0, %v61_v12 }
  0x7b   :  { %v65_v14 = vmul.f32 %v63_v13, %v63_v13 }
  0x7d   :  { %v67_v15 = vsel %vm47_vm0, %v65_v14, 0.0 }
  0x7e   :  { %68 = vadd.xlane.f32.xlu1 %v67_v15  ;;  %v53_v16 = vpop.xlane.xlu0 %52 }
  0x7f   :  { %v62_v17 = vmul.f32 %v1281_v10, %v53_v16 }
  0x81   :  { %v64_v18 = vsub.f32 %v1277_v2, %v62_v17 }
  0x83   :  { %v66_v19 = vmul.f32 %v64_v18, %v64_v18 }
  0x85   :  { %v70_v20 = vsel %vm47_vm0, %v66_v19, 0.0 }
  0x86   :  { %71 = vadd.xlane.f32.xlu1 %v70_v20 }
  0xf1   :  { %v69_v25 = vpop.xlane.xlu1 %68 }
  0xf2   :  { %v73_v26 = vmul.f32 %v69_v25, %v1281_v10 }
  0xf4   :  { %v75_v27 = vadd.f32 1e-05, %v73_v26 }
  0xf6   :  { %1112 = vrsqrt.f32 %v75_v27  ;;  %vm83_vm3 = vweird.f32 %v75_v27 }
  0xf9   :  { %v72_v28 = vpop.xlane.xlu1 %71 }
  0xfa   :  { %v74_v29 = vmul.f32 %v72_v28, %v1281_v10 }
  0xfc   :  { %v1113_v30 = vpop.eup %1112  ;;  %v76_v31 = vadd.f32 1e-05, %v74_v29 }
  0xfd   :  { %v78_v32 = vmul.f32 %v1113_v30, %v75_v27  ;;  %vm84_vm2 = vweird.f32 %v1113_v30 }
  0xfe   :  { %1114 = vrsqrt.f32 %v76_v31  ;;  %vm85_vm4 = vmor %vm83_vm3, %vm84_vm2  ;;  %vm93_vm5 = vweird.f32 %v76_v31 }
  0xff   :  { %v79_v33 = vmul.f32 %v1113_v30, %v78_v32 }
 0x101   :  { %v80_v34 = vmul.f32 0.5, %v79_v33 }
 0x103   :  { %v81_v35 = vsub.f32 1.5, %v80_v34 }
 0x104   :  { %v1115_v36 = vpop.eup %1114 }
 0x105   :  { %v82_v37 = vmul.f32 %v1113_v30, %v81_v35  ;;  %v88_v38 = vmul.f32 %v1115_v36, %v76_v31  ;;  %vm94_vm6 = vweird.f32 %v1115_v36 }
 0x106   :  { %vm95_vm7 = vmor %vm93_vm5, %vm94_vm6 }
 0x107   :  { %v86_v40 = vsel %vm85_vm4, %v1113_v30, %v82_v37  ;;  %v89_v41 = vmul.f32 %v1115_v36, %v88_v38 }
 0x108   :  { %v97_v42 = vmul.f32 %v86_v40, %v63_v13 }
 0x109   :  { %v90_v44 = vmul.f32 0.5, %v89_v41 }
 0x10a   :  { %v103_v45 = vmul.f32 %v1102_v39, %v97_v42 }
 0x10b   :  { %v91_v46 = vsub.f32 1.5, %v90_v44 }
 0x10c   :  { %v109_v47 = vadd.f32 %v1103_v43, %v103_v45 }
 0x10d   :  { %v92_v48 = vmul.f32 %v1115_v36, %v91_v46 }
 0x10e   :  { %1049 = vmatmul.msk.f32.vlgmr.msra.gmra.mxu0 %vm47_vm0, %v109_v47 }
 0x10f   :  { %v96_v49 = vsel %vm95_vm7, %v1115_v36, %v92_v48  ;;  %v412_v48 = vld [vmem:[%s1541_s5 + $0x8] sm:$0xff] }
 0x110   :  { %v98_v50 = vmul.f32 %v96_v49, %v64_v18  ;;  %434 = vmatpush.msrb.mxu0 %v412_v48 }
 0x112   :  { %v104_v51 = vmul.f32 %v1102_v39, %v98_v50 }
 0x114   :  { %v110_v52 = vadd.f32 %v1103_v43, %v104_v51 }
 0x116   :  { %1050 = vmatmul.msk.f32.gmra.mxu0 %vm47_vm0, %v110_v52  ;;  %v281_v52 = vld [vmem:[%s1541_s5] sm:$0xff] }
 0x117   :  { %463 = vmatpush.msra.mxu0 %v281_v52 }
 0x18b   :  { %v142_v54 = vpop.f32.mrf.mxu0 }
 0x18c   :  { %v1314_v55 = vadd.f32 %v1104_v53, %v142_v54 }
 0x18e   :  { %284 = vrot.lane.b32.xlu0 %v1314_v55, %s1183_s2  ;;  %151 = vrot.lane.b32.xlu2 %v1314_v55, %s1184_s23  ;;  %v1319_v56 = vmul.f32 0.35355338, %v1314_v55 }
 0x190   :  { %282 = vrot.lane.b32.xlu1 %v1319_v56, %s1185_s24 }
 0x193   :  { %v145_v57 = vpop.f32.mrf.mxu0 }
 0x194   :  { %v1322_v58 = vadd.f32 %v1104_v53, %v145_v57 }
 0x196   :  { %180 = vrot.lane.b32.xlu2 %v1322_v58, %s1184_s23  ;;  %v1327_v59 = vmul.f32 0.35355338, %v1322_v58 }
 0x19e   :  { %312 = vrot.lane.b32.xlu2 %v1322_v58, %s1183_s2 }
 0x1a6   :  { %310 = vrot.lane.b32.xlu2 %v1327_v59, %s1185_s24 }
 0x1e8   :  { %v152_v60 = vpop.permute.xlu2 %151 }
 0x1e9   :  { %1051 = vmatpush.xpose.msk.msra.mxu1 %vm153_vm8, %v152_v60 }
 0x1ec   :  { %1052 = vmatmul.msk.f32.vlgmr.msra.gmra.mxu1 %vm153_vm8, %v1319_v56 }
 0x1f0   :  { %v181_v61 = vpop.permute.xlu2 %180 }
 0x1f1   :  { %1053 = vmatpush.xpose.msk.msra.mxu2 %vm153_vm8, %v181_v61 }
 0x1f4   :  { %1054 = vmatmul.msk.f32.vlgmr.msra.gmra.mxu2 %vm153_vm8, %v1327_v59 }
 0x1f8   :  { %v313_v62 = vpop.permute.xlu2 %312 }
 0x1f9   :  { %1059 = vmatpush.xpose.msk.msrb.mxu2 %vm153_vm8, %v313_v62 }
 0x200   :  { %v311_v63 = vpop.permute.xlu2 %310  ;;  %v285_v1 = vpop.permute.xlu0 %284 }
 0x201   :  { %1057 = vmatpush.xpose.msk.msrb.mxu1 %vm153_vm8, %v285_v1  ;;  %1060 = vmatmul.msk.f32.vlgmr.msrb.gmra.mxu2 %vm153_vm8, %v311_v63 }
 0x202   :  { %v283_v3 = vpop.permute.xlu1 %282 }
 0x204   :  { %1058 = vmatmul.msk.f32.vlgmr.msrb.gmra.mxu1 %vm153_vm8, %v283_v3 }
 0x269   :  { %v176_v4 = vpop.f32.mrf.mxu1 }
 0x26a   :  { %v207_v5 = vsel %vm153_vm8, %v176_v4, -inf }
 0x26b   :  { %208 = vmax.xlane.f32.xlu2 %v207_v5 }
 0x277   :  { %v204_v6 = vpop.f32.mrf.mxu2 }
 0x278   :  { %v210_v7 = vsel %vm153_vm8, %v204_v6, -inf }
 0x279   :  { %211 = vmax.xlane.f32.xlu0 %v210_v7 }
 0x281   :  { %v307_v8 = vpop.f32.mrf.mxu1 }
 0x282   :  { %v338_v9 = vsel %vm153_vm8, %v307_v8, -inf }
 0x283   :  { %229 = vrot.lane.b32.xlu2 %v1314_v55, %s1186_s4  ;;  %339 = vmax.xlane.f32.xlu1 %v338_v9 }
 0x284   :  { %v335_v28 = vpop.f32.mrf.mxu2 }
 0x285   :  { %v341_v29 = vsel %vm153_vm8, %v335_v28, -inf }
 0x28d   :  { %255 = vrot.lane.b32.xlu0 %v1322_v58, %s1186_s4 }
 0x2de   :  { %v209_v11 = vpop.xlane.xlu2 %208 }
 0x2df   :  { %v213_v12 = vsub.f32 %v176_v4, %v209_v11 }
 0x2e1   :  { %v215_v13 = vmul.f32 1.442695, %v213_v12 }
 0x2e3   :  { %1116 = vpow2.f32 %v215_v13 }
 0x2e6   :  { %v230_v14 = vpop.permute.xlu2 %229 }
 0x2e7   :  { %250 = vmatpush.msra.mxu3 %v230_v14 }
 0x2e9   :  { %v1117_v15 = vpop.eup %1116 }
 0x2ea   :  { %v219_v16 = vsel %vm153_vm8, %v1117_v15, 0.0 }
 0x2eb   :  { %220 = vadd.xlane.f32.xlu2 %v219_v16 }
 0x2ec   :  { %v212_v17 = vpop.xlane.xlu0 %211 }
 0x2ed   :  { %v214_v18 = vsub.f32 %v204_v6, %v212_v17 }
 0x2ef   :  { %v217_v19 = vmul.f32 1.442695, %v214_v18 }
 0x2f1   :  { %1118 = vpow2.f32 %v217_v19 }
 0x2f6   :  { %v340_v20 = vpop.xlane.xlu1 %339 }
 0x2f7   :  { %v1119_v21 = vpop.eup %1118  ;;  %v344_v22 = vsub.f32 %v307_v8, %v340_v20 }
 0x2f8   :  { %v222_v23 = vsel %vm153_vm8, %v1119_v21, 0.0 }
 0x2f9   :  { %v346_v24 = vmul.f32 1.442695, %v344_v22  ;;  %223 = vadd.xlane.f32.xlu0 %v222_v23 }
 0x2fb   :  { %1120 = vpow2.f32 %v346_v24 }
 0x2ff   :  { %v256_v25 = vpop.permute.xlu0 %255 }
 0x300   :  { %276 = vmatpush.msrb.mxu3 %v256_v25 }
 0x301   :  { %v1121_v26 = vpop.eup %1120 }
 0x302   :  { %v350_v27 = vsel %vm153_vm8, %v1121_v26, 0.0 }
 0x303   :  { %473 = vrot.lane.b32.xlu2 %v1314_v55, %s1187_s25  ;;  %351 = vadd.xlane.f32.xlu1 %v350_v27 }
 0x30d   :  { %471 = vrot.lane.b32.xlu0 %v1319_v56, %s1188_s26 }
 0x31c   :  { %360 = vrot.lane.b32.xlu1 %v1314_v55, %s1189_s27 }
 0x324   :  { %386 = vrot.lane.b32.xlu1 %v1322_v58, %s1189_s27 }
 0x32c   :  { %342 = vmax.xlane.f32.xlu2 %v341_v29 }
 0x344   :  { %499 = vrot.lane.b32.xlu2 %v1327_v59, %s1188_s26 }
 0x35e   :  { %v221_v30 = vpop.xlane.xlu2 %220 }
 0x35f   :  { %1122 = vrcp.f32 %v221_v30 }
 0x365   :  { %v1123_v31 = vpop.eup %1122 }
 0x366   :  { %v227_v32 = vmul.f32 %v1123_v31, %v1117_v15  ;;  %v474_v40 = vpop.permute.xlu2 %473 }
 0x368   :  { %1055 = vmatmul.msk.f32.vlgmr.msra.gmra.mxu3 %vm153_vm8, %v227_v32 }
 0x36c   :  { %v224_v33 = vpop.xlane.xlu0 %223 }
 0x36d   :  { %1124 = vrcp.f32 %v224_v33 }
 0x373   :  { %v1125_v34 = vpop.eup %1124 }
 0x374   :  { %v228_v35 = vmul.f32 %v1125_v34, %v1119_v21 }
 0x376   :  { %1056 = vmatmul.msk.f32.vlgmr.msrb.gmra.mxu3 %vm153_vm8, %v228_v35  ;;  %v352_v36 = vpop.xlane.xlu1 %351 }
 0x377   :  { %1126 = vrcp.f32 %v352_v36 }
 0x37d   :  { %v1127_v37 = vpop.eup %1126 }
 0x37e   :  { %v358_v38 = vmul.f32 %v1127_v37, %v1121_v26  ;;  %v601_v26 = vld [vmem:[%s1541_s5 + $0x10] sm:$0xff] }
 0x37f   :  { %v472_v42 = vpop.permute.xlu0 %471  ;;  %623 = vmatpush.msra.mxu2 %v601_v26 }
 0x38e   :  { %v361_v39 = vpop.permute.xlu1 %360 }
 0x38f   :  { %381 = vmatpush.msra.mxu3 %v361_v39 }
 0x390   :  { %1061 = vmatmul.msk.f32.vlgmr.msra.gmra.mxu3 %vm153_vm8, %v358_v38 }
 0x391   :  { %1067 = vmatpush.xpose.msk.msrb.mxu3 %vm153_vm8, %v474_v40 }
 0x396   :  { %v387_v41 = vpop.permute.xlu1 %386 }
 0x397   :  { %407 = vmatpush.msra.mxu1 %v387_v41 }
 0x398   :  { %1068 = vmatmul.msk.f32.vlgmr.msrb.gmra.mxu3 %vm153_vm8, %v472_v42 }
 0x39f   :  { %v343_v43 = vpop.xlane.xlu2 %342 }
 0x3a0   :  { %v345_v44 = vsub.f32 %v335_v28, %v343_v43 }
 0x3a2   :  { %v348_v45 = vmul.f32 1.442695, %v345_v44 }
 0x3a4   :  { %1128 = vpow2.f32 %v348_v45 }
 0x3a7   :  { %v500_v63 = vpop.permute.xlu2 %499 }
 0x3aa   :  { %v1129_v46 = vpop.eup %1128 }
 0x3ab   :  { %v353_v47 = vsel %vm153_vm8, %v1129_v46, 0.0 }
 0x3ac   :  { %354 = vadd.xlane.f32.xlu0 %v353_v47 }
 0x3c0   :  { %501 = vrot.lane.b32.xlu0 %v1322_v58, %s1187_s25 }
 0x3c8   :  { %635 = vrot.lane.b32.xlu0 %v1314_v55, %s1190_s28 }
 0x3d0   :  { %663 = vrot.lane.b32.xlu0 %v1322_v58, %s1190_s28 }
 0x3eb   :  { %v252_v49 = vpop.f32.mrf.mxu3 }
 0x3f9   :  { %v278_v50 = vpop.f32.mrf.mxu3 }
 0x413   :  { %v383_v51 = vpop.f32.mrf.mxu3 }
 0x414   :  { %1063 = vmatmul.msk.f32.vlgmr.msrb.gmra.mxu0 %vm153_vm8, %v383_v51 }
 0x41b   :  { %v496_v53 = vpop.f32.mrf.mxu3 }
 0x41c   :  { %v527_v54 = vsel %vm153_vm8, %v496_v53, -inf }
 0x41d   :  { %528 = vmax.xlane.f32.xlu1 %v527_v54 }
 0x41f   :  { %v355_v57 = vpop.xlane.xlu0 %354 }
 0x420   :  { %1130 = vrcp.f32 %v355_v57 }
 0x426   :  { %v1131_v60 = vpop.eup %1130 }
 0x427   :  { %v359_v61 = vmul.f32 %v1131_v60, %v1129_v46 }
 0x429   :  { %1062 = vmatmul.msk.f32.vlgmr.msra.gmra.mxu1 %vm153_vm8, %v359_v61 }
 0x432   :  { %v502_v62 = vpop.permute.xlu0 %501 }
 0x433   :  { %1069 = vmatpush.xpose.msk.msrb.mxu1 %vm153_vm8, %v502_v62 }
 0x436   :  { %549 = vrot.lane.b32.xlu1 %v1314_v55, %s1191_s15  ;;  %1070 = vmatmul.msk.f32.vlgmr.msrb.gmra.mxu1 %vm153_vm8, %v500_v63 }
 0x43a   :  { %v636_v1 = vpop.permute.xlu0 %635 }
 0x43b   :  { %1075 = vmatpush.xpose.msk.msrb.mxu0 %vm153_vm8, %v636_v1 }
 0x43e   :  { %661 = vrot.lane.b32.xlu1 %v1327_v59, %s1192_s16 }
 0x442   :  { %v664_v11 = vpop.permute.xlu0 %663 }
 0x490   :  { %v529_v3 = vpop.xlane.xlu1 %528 }
 0x491   :  { %v533_v4 = vsub.f32 %v496_v53, %v529_v3  ;;  %v436_v17 = vpop.f32.mrf.mxu0  ;;  %v1105_v3 = vld [vmem:[%s1542_s6] ss:$0 sm:$0xff] }
 0x493   :  { %v535_v5 = vmul.f32 1.442695, %v533_v4 }
 0x495   :  { %1132 = vpow2.f32 %v535_v5 }
 0x49b   :  { %v1133_v6 = vpop.eup %1132 }
 0x49c   :  { %v539_v7 = vsel %vm153_vm8, %v1133_v6, 0.0 }
 0x49d   :  { %540 = vadd.xlane.f32.xlu2 %v539_v7 }
 0x4a6   :  { %v409_v8 = vpop.f32.mrf.mxu1 }
 0x4a7   :  { %1064 = vmatmul.msk.f32.gmra.mxu0 %vm153_vm8, %v409_v8 }
 0x4a8   :  { %v550_v9 = vpop.permute.xlu1 %549 }
 0x4a9   :  { %570 = vmatpush.msra.mxu3 %v550_v9 }
 0x4ab   :  { %1077 = vmatpush.xpose.msk.msrb.mxu3 %vm153_vm8, %v664_v11 }
 0x4af   :  { %1065 = vmatmul.msk.f32.vlgmr.msra.gmra.mxu0 %vm153_vm8, %v252_v49 }
 0x4b0   :  { %v662_v18 = vpop.permute.xlu1 %661 }
 0x4b3   :  { %v524_v12 = vpop.f32.mrf.mxu1 }
 0x4b4   :  { %v530_v59 = vsel %vm153_vm8, %v524_v12, -inf }
 0x4b5   :  { %633 = vrot.lane.b32.xlu2 %v1319_v56, %s1192_s16  ;;  %531 = vmax.xlane.f32.xlu0 %v530_v59  ;;  %s1194_s16 = smov [#allocation2]  }
 0x4b6   :  { %s1035_s17 = sshll.u32 %s1194_s16, 4  ;;  %s1036_s17 = int_to_ptr.vmem [resolvable:$true] %s1035_s17 }
 0x4b7   :  { %1066 = vmatmul.msk.f32.gmra.mxu0 %vm153_vm8, %v278_v50 }
 0x510   :  { %v541_v13 = vpop.xlane.xlu2 %540 }
 0x511   :  { %1134 = vrcp.f32 %v541_v13 }
 0x517   :  { %v1135_v14 = vpop.eup %1134 }
 0x518   :  { %v547_v15 = vmul.f32 %v1135_v14, %v1133_v6  ;;  %v634_v16 = vpop.permute.xlu2 %633 }
 0x519   :  { %1076 = vmatmul.msk.f32.vlgmr.msrb.gmra.mxu0 %vm153_vm8, %v634_v16 }
 0x51a   :  { %1071 = vmatmul.msk.f32.vlgmr.msra.gmra.mxu3 %vm153_vm8, %v547_v15 }
 0x522   :  { %1078 = vmatmul.msk.f32.vlgmr.msrb.gmra.mxu3 %vm153_vm8, %v662_v18 }
 0x524   :  { %v1390_v19 = vpop.f32.mrf.mxu0 }
 0x528   :  { %v532_v20 = vpop.xlane.xlu0 %531 }
 0x529   :  { %v534_v56 = vsub.f32 %v524_v12, %v532_v20 }
 0x52b   :  { %v537_v21 = vmul.f32 1.442695, %v534_v56 }
 0x52c   :  { %v465_v22 = vpop.f32.mrf.mxu0 }
 0x52d   :  { %1136 = vpow2.f32 %v537_v21  ;;  %v1392_v23 = vadd.f32 %v465_v22, %v436_v17  ;;  %v862_v22 = vld [vmem:[%s1545_s9 + $0x18] sm:$0xff] }
 0x533   :  { %v1137_v24 = vpop.eup %1136 }
 0x534   :  { %v542_v25 = vsel %vm153_vm8, %v1137_v24, 0.0  ;;  %v1398_v27 = vpop.f32.mrf.mxu0 }
 0x535   :  { %543 = vadd.xlane.f32.xlu0 %v542_v25  ;;  %v469_v8 = vadd.f32 %v1398_v27, %v1390_v19  ;;  %v859_v25 = vld [vmem:[%s1545_s9] sm:$0xff] }
 0x596   :  { %v658_v28 = vpop.f32.mrf.mxu0 }
 0x597   :  { %v689_v29 = vsel %vm153_vm8, %v658_v28, -inf }
 0x598   :  { %690 = vmax.xlane.f32.xlu2 %v689_v29 }
 0x59d   :  { %v572_v30 = vpop.f32.mrf.mxu3 }
 0x59e   :  { %1073 = vmatmul.msk.f32.vlgmr.msra.gmra.mxu2 %vm153_vm8, %v572_v30 }
 0x5a5   :  { %v686_v31 = vpop.f32.mrf.mxu3 }
 0x5a6   :  { %v692_v32 = vsel %vm153_vm8, %v686_v31, -inf }
 0x5a7   :  { %693 = vmax.xlane.f32.xlu1 %v692_v32 }
 0x5a8   :  { %v544_v42 = vpop.xlane.xlu0 %543 }
 0x5c0   :  { %575 = vrot.lane.b32.xlu1 %v1322_v58, %s1191_s15 }
 0x60b   :  { %v691_v33 = vpop.xlane.xlu2 %690 }
 0x60c   :  { %v695_v34 = vsub.f32 %v658_v28, %v691_v33 }
 0x60e   :  { %v697_v35 = vmul.f32 1.442695, %v695_v34 }
 0x610   :  { %1138 = vpow2.f32 %v697_v35  ;;  %v1106_v35 = vld [vmem:[%s1543_s7] ss:$0 sm:$0xff] }
 0x616   :  { %v1139_v36 = vpop.eup %1138 }
 0x617   :  { %v701_v37 = vsel %vm153_vm8, %v1139_v36, 0.0 }
 0x618   :  { %702 = vadd.xlane.f32.xlu2 %v701_v37 }
 0x61a   :  { %v694_v38 = vpop.xlane.xlu1 %693 }
 0x61b   :  { %v696_v39 = vsub.f32 %v686_v31, %v694_v38  ;;  %v1107_v38 = vld [vmem:[%s1544_s8] ss:$0 sm:$0xff] }
 0x61d   :  { %v699_v40 = vmul.f32 1.442695, %v696_v39 }
 0x61f   :  { %1140 = vpow2.f32 %v699_v40 }
 0x620   :  { %1142 = vrcp.f32 %v544_v42 }
 0x621   :  { %v625_v61 = vpop.f32.mrf.mxu2 }
 0x622   :  { %v631_v62 = vadd.f32 %v625_v61, %v1392_v23  ;;  %v861_v23 = vld [vmem:[%s1545_s9 + $0x10] sm:$0xff] }
 0x625   :  { %v1141_v41 = vpop.eup %1140 }
 0x626   :  { %v704_v43 = vsel %vm153_vm8, %v1141_v41, 0.0  ;;  %v1143_v44 = vpop.eup %1142 }
 0x627   :  { %705 = vadd.xlane.f32.xlu0 %v704_v43  ;;  %v548_v45 = vmul.f32 %v1143_v44, %v1137_v24  ;;  %v860_v24 = vld [vmem:[%s1545_s9 + $0x8] sm:$0xff] }
 0x630   :  { %711 = vrot.lane.b32.xlu2 %v1314_v55, %s1193_s3 }
 0x632   :  { %v576_v46 = vpop.permute.xlu1 %575 }
 0x633   :  { %596 = vmatpush.msra.mxu1 %v576_v46 }
 0x634   :  { %1072 = vmatmul.msk.f32.vlgmr.msra.gmra.mxu1 %vm153_vm8, %v548_v45 }
 0x63b   :  { %737 = vrot.lane.b32.xlu0 %v1322_v58, %s1193_s3  ;;  %v763_v58 = vld [vmem:[%s1541_s5 + $0x18] sm:$0xff] }
 0x63c   :  { %785 = vmatpush.msra.mxu3 %v763_v58  ;;  %v1108_v58 = vld [vmem:[%s1546_s10] ss:$0 sm:$0xff] }
 0x68b   :  { %v703_v47 = vpop.xlane.xlu2 %702 }
 0x68c   :  { %1144 = vrcp.f32 %v703_v47 }
 0x692   :  { %v1145_v48 = vpop.eup %1144 }
 0x693   :  { %v709_v49 = vmul.f32 %v1145_v48, %v1139_v36  ;;  %v712_v50 = vpop.permute.xlu2 %711 }
 0x694   :  { %732 = vmatpush.msrb.mxu1 %v712_v50 }
 0x695   :  { %1079 = vmatmul.msk.f32.vlgmr.msrb.gmra.mxu1 %vm153_vm8, %v709_v49 }
 0x696   :  { %885 = vmatpush.msra.mxu1 %v862_v22 }
 0x698   :  { %886 = vmatpush.msra.mxu1 %v861_v23  ;;  %v985_v23 = vld [vmem:[%s1547_s11 + $0x8] sm:$0xff] }
 0x69a   :  { %v706_v51 = vpop.xlane.xlu0 %705  ;;  %887 = vmatpush.msra.mxu1 %v860_v24 }
 0x69b   :  { %1146 = vrcp.f32 %v706_v51 }
 0x69c   :  { %888 = vmatpush.msra.mxu1 %v859_v25  ;;  %v984_v25 = vld [vmem:[%s1547_s11] sm:$0xff] }
 0x6a1   :  { %v1147_v52 = vpop.eup %1146 }
 0x6a2   :  { %v710_v53 = vmul.f32 %v1147_v52, %v1141_v41 }
 0x6ad   :  { %v738_v55 = vpop.permute.xlu0 %737 }
 0x6ae   :  { %758 = vmatpush.msra.mxu0 %v738_v55  ;;  %v998_v55 = vld [vmem:[%s1547_s11 + $0x70] sm:$0xff] }
 0x6af   :  { %1080 = vmatmul.msk.f32.vlgmr.msra.gmra.mxu0 %vm153_vm8, %v710_v53 }
 0x6b1   :  { %v598_v54 = vpop.f32.mrf.mxu1 }
 0x6b2   :  { %1074 = vmatmul.msk.f32.gmra.mxu2 %vm153_vm8, %v598_v54  ;;  %v997_v54 = vld [vmem:[%s1547_s11 + $0x68] sm:$0xff] }
 0x712   :  { %v734_v57 = vpop.f32.mrf.mxu1 }
 0x713   :  { %1081 = vmatmul.msk.f32.vlgmr.msra.gmra.mxu3 %vm153_vm8, %v734_v57  ;;  %v996_v57 = vld [vmem:[%s1547_s11 + $0x60] sm:$0xff] }
 0x72c   :  { %v760_v60 = vpop.f32.mrf.mxu0 }
 0x72d   :  { %1082 = vmatmul.msk.f32.gmra.mxu3 %vm153_vm8, %v760_v60  ;;  %v995_v60 = vld [vmem:[%s1547_s11 + $0x58] sm:$0xff] }
 0x735   :  { %v628_v7 = vpop.f32.mrf.mxu2 }
 0x736   :  { %v632_v9 = vadd.f32 %v628_v7, %v469_v8  ;;  %v991_v8 = vld [vmem:[%s1547_s11 + $0x38] sm:$0xff] }
 0x796   :  { %v787_v63 = vpop.f32.mrf.mxu3 }
 0x797   :  { %v793_v1 = vadd.f32 %v787_v63, %v631_v62  ;;  %v994_v63 = vld [vmem:[%s1547_s11 + $0x50] sm:$0xff] }
 0x799   :  { %v795_v4 = vadd.f32 %v793_v1, %v1270_v0 }
 0x79b   :  { %v1423_v5 = vadd.f32 %v1105_v3, %v795_v4 }
 0x79d   :  { %v803_v6 = vsel %vm47_vm0, %v1423_v5, 0.0 }
 0x79e   :  { %804 = vadd.xlane.f32.xlu1 %v803_v6  ;;  %v992_v6 = vld [vmem:[%s1547_s11 + $0x40] sm:$0xff] }
 0x7b0   :  { %v790_v11 = vpop.f32.mrf.mxu3 }
 0x7b1   :  { %v794_v12 = vadd.f32 %v790_v11, %v632_v9 }
 0x7b3   :  { %v796_v59 = vadd.f32 %v794_v12, %v1277_v2  ;;  %v990_v12 = vld [vmem:[%s1547_s11 + $0x30] sm:$0xff] }
 0x7b5   :  { %v1430_v13 = vadd.f32 %v1105_v3, %v796_v59  ;;  %v993_v3 = vld [vmem:[%s1547_s11 + $0x48] sm:$0xff] }
 0x7b7   :  { %v806_v0 = vsel %vm47_vm0, %v1430_v13, 0.0 }
 0x7b8   :  { %807 = vadd.xlane.f32.xlu2 %v806_v0 }
 0x811   :  { %v805_v14 = vpop.xlane.xlu1 %804 }
 0x812   :  { %v809_v15 = vmul.f32 %v805_v14, %v1281_v10  ;;  %v989_v14 = vld [vmem:[%s1547_s11 + $0x28] sm:$0xff] }
 0x814   :  { %v811_v16 = vsub.f32 %v1423_v5, %v809_v15 }
 0x816   :  { %v813_v17 = vmul.f32 %v811_v16, %v811_v16 }
 0x818   :  { %v815_v18 = vsel %vm47_vm0, %v813_v17, 0.0  ;;  %v988_v17 = vld [vmem:[%s1547_s11 + $0x20] sm:$0xff] }
 0x819   :  { %816 = vadd.xlane.f32.xlu0 %v815_v18 }
 0x82b   :  { %v808_v19 = vpop.xlane.xlu2 %807 }
 0x82c   :  { %v810_v20 = vmul.f32 %v808_v19, %v1281_v10 }
 0x82e   :  { %v812_v2 = vsub.f32 %v1430_v13, %v810_v20  ;;  %v987_v20 = vld [vmem:[%s1547_s11 + $0x18] sm:$0xff] }
 0x830   :  { %v814_v56 = vmul.f32 %v812_v2, %v812_v2 }
 0x832   :  { %v818_v21 = vsel %vm47_vm0, %v814_v56, 0.0  ;;  %v986_v56 = vld [vmem:[%s1547_s11 + $0x10] sm:$0xff] }
 0x833   :  { %819 = vadd.xlane.f32.xlu1 %v818_v21 }
 0x88c   :  { %v817_v26 = vpop.xlane.xlu0 %816 }
 0x88d   :  { %v821_v27 = vmul.f32 %v817_v26, %v1281_v10 }
 0x88f   :  { %v823_v28 = vadd.f32 1e-05, %v821_v27 }
 0x891   :  { %1148 = vrsqrt.f32 %v823_v28  ;;  %vm831_vm10 = vweird.f32 %v823_v28 }
 0x897   :  { %v1149_v29 = vpop.eup %1148 }
 0x898   :  { %v826_v30 = vmul.f32 %v1149_v29, %v823_v28  ;;  %vm832_vm9 = vweird.f32 %v1149_v29 }
 0x899   :  { %vm833_vm11 = vmor %vm831_vm10, %vm832_vm9 }
 0x89a   :  { %v827_v31 = vmul.f32 %v1149_v29, %v826_v30 }
 0x89c   :  { %v828_v32 = vmul.f32 0.5, %v827_v31 }
 0x89e   :  { %v829_v33 = vsub.f32 1.5, %v828_v32 }
 0x8a0   :  { %v830_v34 = vmul.f32 %v1149_v29, %v829_v33 }
 0x8a2   :  { %v834_v36 = vsel %vm833_vm11, %v1149_v29, %v830_v34 }
 0x8a3   :  { %v845_v37 = vmul.f32 %v834_v36, %v811_v16 }
 0x8a5   :  { %v851_v39 = vmul.f32 %v1106_v35, %v845_v37 }
 0x8a6   :  { %v820_v40 = vpop.xlane.xlu1 %819 }
 0x8a7   :  { %v822_v41 = vmul.f32 %v820_v40, %v1281_v10  ;;  %v857_v42 = vadd.f32 %v1107_v38, %v851_v39  ;;  %v999_v10 = vld [vmem:[%s1547_s11 + $0x78] sm:$0xff] }
 0x8a8   :  { %1004 = vmatpush.msrb.mxu2 %v999_v10 }
 0x8a9   :  { %v824_v43 = vadd.f32 1e-05, %v822_v41  ;;  %1083 = vmatmul.msk.f32.vlgmr.msra.gmra.mxu1 %vm47_vm0, %v857_v42 }
 0x8aa   :  { %1005 = vmatpush.msrb.mxu2 %v998_v55 }
 0x8ab   :  { %1150 = vrsqrt.f32 %v824_v43  ;;  %vm841_vm13 = vweird.f32 %v824_v43 }
 0x8ac   :  { %1006 = vmatpush.msrb.mxu2 %v997_v54 }
 0x8ae   :  { %1007 = vmatpush.msrb.mxu2 %v996_v57 }
 0x8b0   :  { %1008 = vmatpush.msrb.mxu2 %v995_v60 }
 0x8b1   :  { %v1151_v44 = vpop.eup %1150 }
 0x8b2   :  { %v836_v45 = vmul.f32 %v1151_v44, %v824_v43  ;;  %vm842_vm12 = vweird.f32 %v1151_v44  ;;  %1009 = vmatpush.msrb.mxu2 %v994_v63 }
 0x8b3   :  { %vm843_vm14 = vmor %vm841_vm13, %vm842_vm12 }
 0x8b4   :  { %v837_v46 = vmul.f32 %v1151_v44, %v836_v45  ;;  %1010 = vmatpush.msrb.mxu2 %v993_v3 }
 0x8b6   :  { %v838_v47 = vmul.f32 0.5, %v837_v46  ;;  %1011 = vmatpush.msrb.mxu2 %v992_v6 }
 0x8b8   :  { %v839_v48 = vsub.f32 1.5, %v838_v47  ;;  %1012 = vmatpush.msrb.mxu2 %v991_v8 }
 0x8ba   :  { %v840_v49 = vmul.f32 %v1151_v44, %v839_v48  ;;  %1013 = vmatpush.msrb.mxu2 %v990_v12 }
 0x8bc   :  { %v844_v50 = vsel %vm843_vm14, %v1151_v44, %v840_v49  ;;  %1014 = vmatpush.msrb.mxu2 %v989_v14 }
 0x8bd   :  { %v846_v51 = vmul.f32 %v844_v50, %v812_v2 }
 0x8be   :  { %1015 = vmatpush.msrb.mxu2 %v988_v17 }
 0x8bf   :  { %v852_v52 = vmul.f32 %v1106_v35, %v846_v51 }
 0x8c0   :  { %1016 = vmatpush.msrb.mxu2 %v987_v20 }
 0x8c1   :  { %v858_v53 = vadd.f32 %v1107_v38, %v852_v52 }
 0x8c2   :  { %1017 = vmatpush.msrb.mxu2 %v986_v56 }
 0x8c3   :  { %1084 = vmatmul.msk.f32.gmra.mxu1 %vm47_vm0, %v858_v53 }
 0x8c4   :  { %1018 = vmatpush.msrb.mxu2 %v985_v23 }
 0x8c6   :  { %1019 = vmatpush.msrb.mxu2 %v984_v25 }
 0x926   :  { %v890_v61 = vpop.f32.mrf.mxu1 }
 0x927   :  { %v1480_v62 = vadd.f32 %v1108_v58, %v890_v61 }
 0x929   :  { %v1486_v1 = vmul.f32 0.70710677, %v1480_v62  ;;  %v896_v6 = vmul.f32 0.5, %v1480_v62 }
 0x92b   :  { %v900_v4 = vmul.f32 %v1486_v1, %v1486_v1 }
 0x92d   :  { %v901_v7 = vmin.f32 %v900_v4, 16.0 }
 0x92f   :  { %v902_v9 = vmul.f32 2.1237322e-06, %v901_v7  ;;  %v913_v11 = vmul.f32 3.8918573e-05, %v901_v7 }
 0x931   :  { %v903_v59 = vadd.f32 0.00028619796, %v902_v9  ;;  %v914_v0 = vadd.f32 0.001143296, %v913_v11 }
 0x933   :  { %v904_v15 = vmul.f32 %v903_v59, %v901_v7  ;;  %v915_v16 = vmul.f32 %v914_v0, %v901_v7 }
 0x935   :  { %v905_v18 = vadd.f32 0.0036580483, %v904_v15  ;;  %v916_v19 = vadd.f32 0.014752088, %v915_v16 }
 0x937   :  { %v917_v2 = vmul.f32 %v916_v19, %v901_v7  ;;  %v906_v21 = vmul.f32 %v905_v18, %v901_v7 }
 0x939   :  { %v918_v22 = vadd.f32 0.112945676, %v917_v2  ;;  %v907_v26 = vadd.f32 0.05243302, %v906_v21 }
 0x93b   :  { %v919_v24 = vmul.f32 %v918_v22, %v901_v7  ;;  %v908_v30 = vmul.f32 %v907_v26, %v901_v7 }
 0x93d   :  { %v920_v27 = vadd.f32 0.4994258, %v919_v24  ;;  %v909_v34 = vadd.f32 0.18741608, %v908_v30 }
 0x93f   :  { %v921_v28 = vmul.f32 %v920_v27, %v901_v7  ;;  %v910_v38 = vmul.f32 %v909_v34, %v901_v7 }
 0x940   :  { %v893_v29 = vpop.f32.mrf.mxu1 }
 0x941   :  { %v922_v31 = vadd.f32 1.0, %v921_v28  ;;  %v1520_v32 = vadd.f32 %v1108_v58, %v893_v29  ;;  %v911_v45 = vadd.f32 1.1283791, %v910_v38  ;;  %v1109_v29 = vld [vmem:[%s1548_s12] ss:$0 sm:$0xff]  ;;  %s1195_s12 = smov 128  }
 0x943   :  { %1152 = vrcp.f32 %v922_v31  ;;  %v899_v33 = vmul.f32 0.70710677, %v1520_v32  ;;  %v932_v46 = vand.u32 2147483647, %v922_v31  ;;  %v934_v47 = vand.u32 2147483648, %v922_v31 }
 0x944   :  { %vm928_vm1 = vweird.f32 %v922_v31  ;;  %v912_v55 = vmul.f32 %v911_v45, %v1486_v1  ;;  %v897_v26 = vmul.f32 0.5, %v1520_v32 }
 0x945   :  { %v940_v35 = vmul.f32 %v899_v33, %v899_v33  ;;  %v935_v53 = vor.u32 1.1754944e-38, %v934_v47  ;;  %vm933_vm3 = vcmp.eq.f32.partialorder %v932_v46, 8.507059e+37 }
 0x947   :  { %v941_v36 = vmin.f32 %v940_v35, 16.0 }
 0x949   :  { %v1153_v37 = vpop.eup %1152  ;;  %v942_v40 = vmul.f32 2.1237322e-06, %v941_v36  ;;  %v953_v41 = vmul.f32 3.8918573e-05, %v941_v36 }
 0x94a   :  { %v924_v39 = vmul.f32 %v1153_v37, %v922_v31  ;;  %vm929_vm15 = vweird.f32 %v1153_v37 }
 0x94b   :  { %v943_v43 = vadd.f32 0.00028619796, %v942_v40  ;;  %v954_v44 = vadd.f32 0.001143296, %v953_v41  ;;  %vm930_vm2 = vmor %vm928_vm1, %vm929_vm15 }
 0x94c   :  { %v925_v42 = vsub.f32 1.0, %v924_v39 }
 0x94d   :  { %v944_v49 = vmul.f32 %v943_v43, %v941_v36  ;;  %v955_v50 = vmul.f32 %v954_v44, %v941_v36 }
 0x94e   :  { %v926_v48 = vmul.f32 %v1153_v37, %v925_v42 }
 0x94f   :  { %v956_v52 = vadd.f32 0.014752088, %v955_v50  ;;  %v945_v10 = vadd.f32 0.0036580483, %v944_v49 }
 0x950   :  { %v927_v51 = vadd.f32 %v1153_v37, %v926_v48 }
 0x951   :  { %v957_v58 = vmul.f32 %v956_v52, %v941_v36  ;;  %v946_v63 = vmul.f32 %v945_v10, %v941_v36 }
 0x952   :  { %v931_v54 = vsel %vm930_vm2, %v1153_v37, %v927_v51 }
 0x953   :  { %v936_v57 = vsel %vm933_vm3, %v935_v53, %v931_v54  ;;  %v958_v61 = vadd.f32 0.112945676, %v957_v58  ;;  %v947_v9 = vadd.f32 0.05243302, %v946_v63 }
 0x954   :  { %v937_v60 = vmul.f32 %v936_v57, %v912_v55 }
 0x955   :  { %v959_v4 = vmul.f32 %v958_v61, %v941_v36  ;;  %v948_v0 = vmul.f32 %v947_v9, %v941_v36 }
 0x956   :  { %v1085_v3 = vclamps-f32 %v937_v60, 1.0 }
 0x957   :  { %v960_v8 = vadd.f32 0.4994258, %v959_v4  ;;  %v949_v1 = vadd.f32 0.18741608, %v948_v0 }
 0x958   :  { %v980_v7 = vadd.f32 1.0, %v1085_v3 }
 0x959   :  { %v961_v12 = vmul.f32 %v960_v8, %v941_v36  ;;  %v950_v15 = vmul.f32 %v949_v1, %v941_v36 }
 0x95a   :  { %v982_v11 = vmul.f32 %v980_v7, %v896_v6 }
 0x95b   :  { %v962_v59 = vadd.f32 1.0, %v961_v12  ;;  %v951_v19 = vadd.f32 1.1283791, %v950_v15 }
 0x95c   :  { %1020 = vmatmul.f32.vlgmr.msrb.gmra.mxu2 %v982_v11 }
 0x95d   :  { %1154 = vrcp.f32 %v962_v59  ;;  %v974_v18 = vand.u32 2147483648, %v962_v59  ;;  %v972_v2 = vand.u32 2147483647, %v962_v59  ;;  %vm968_vm5 = vweird.f32 %v962_v59 }
 0x95e   :  { %v952_v21 = vmul.f32 %v951_v19, %v899_v33 }
 0x95f   :  { %v975_v56 = vor.u32 1.1754944e-38, %v974_v18  ;;  %vm973_vm7 = vcmp.eq.f32.partialorder %v972_v2, 8.507059e+37 }
 0x963   :  { %v1155_v14 = vpop.eup %1154 }
 0x964   :  { %v964_v16 = vmul.f32 %v1155_v14, %v962_v59  ;;  %vm969_vm4 = vweird.f32 %v1155_v14 }
 0x965   :  { %vm970_vm6 = vmor %vm968_vm5, %vm969_vm4 }
 0x966   :  { %v965_v17 = vsub.f32 1.0, %v964_v16 }
 0x968   :  { %v966_v20 = vmul.f32 %v1155_v14, %v965_v17 }
 0x96a   :  { %v967_v62 = vadd.f32 %v1155_v14, %v966_v20 }
 0x96c   :  { %v971_v22 = vsel %vm970_vm6, %v1155_v14, %v967_v62 }
 0x96d   :  { %v976_v23 = vsel %vm973_vm7, %v975_v56, %v971_v22 }
 0x96e   :  { %v977_v24 = vmul.f32 %v976_v23, %v952_v21 }
 0x970   :  { %v1086_v25 = vclamps-f32 %v977_v24, 1.0 }
 0x972   :  { %v981_v27 = vadd.f32 1.0, %v1086_v25 }
 0x974   :  { %v983_v28 = vmul.f32 %v981_v27, %v897_v26 }
 0x976   :  { %1023 = vmatmul.f32.gmra.mxu2 %v983_v28 }
 0x9df   :  { %v1021_v30 = vpop.f32.mrf.mxu2 }
 0x9e0   :  { %v1022_v31 = vadd.f32 %v1109_v29, %v1021_v30 }
 0x9e2   :  { %v1027_v34 = vadd.f32 %v1022_v31, %v1423_v5 }
 0x9e4   :  { %1029 = vst.msk [vmem:[#allocation2] sm:$0xff] %vm47_vm0, %v1027_v34 }
 0x9f9   :  { %v1024_v32 = vpop.f32.mrf.mxu2 }
 0x9fa   :  { %v1025_v33 = vadd.f32 %v1109_v29, %v1024_v32 }
 0x9fc   :  { %v1028_v35 = vadd.f32 %v1025_v33, %v1430_v13 }
 0x9fe   :  { %1030 = vst.msk [vmem:[#allocation2 + $0x8] sm:$0xff] %vm47_vm0, %v1028_v35 }
 0x9ff   :  { %1043 = dma.vmem_to_hbm [thread:$0]  %s1036_s17, 256, %s1038_s19, [#allocation3], %s1195_s12, %s1195_s12, %s1196_s20  }
 0xa00   :  { %1180 = dma.done.wait [#allocation3], 256  }
 0xa01   :  { %1181 = vsyncadd [#allocation3], 4294967040 }
 0xa02   :  { %1048 = vsyncpa [#allocation3], 1 }

</bundles_post_ra>
